<compile_context>
chip_gen: v5e
topology: v5e:2x2
jax: 0.10.0
libtpu: 0.0.40
codegen_flags: <defaults>
</compile_context>

<pallas_src>
import math

import jax
import jax.numpy as jnp
from jax.experimental import pallas as pl
from jax.experimental.pallas import tpu as pltpu


def _round_up(x: int, m: int) -> int:
    return ((x + m - 1) // m) * m


def _pad2(x, rows, cols, dtype):
    """Zero-pad a 2-D array to (rows, cols) and cast to dtype (no-op pad if aligned)."""
    x = x.astype(dtype)
    r, c = x.shape
    if r == rows and c == cols:
        return x
    return jnp.zeros((rows, cols), dtype).at[:r, :c].set(x)


def _generator_kernel(z_ref, w1_ref, b1_ref, w2_ref, b2_ref, w3_ref, b3_ref, out_ref):
    """One batch tile of Linear->ReLU->(Dropout=id)->Linear->ReLU->(Dropout=id)->Linear."""
    # Layer 1: MXU matmul (bf16 x bf16 -> f32 accumulate) + bias + ReLU.
    h1 = jnp.dot(z_ref[...], w1_ref[...], preferred_element_type=jnp.float32)
    h1 = jnp.maximum(h1 + b1_ref[...], 0.0)
    # Dropout (eval mode) == identity.
    h1 = h1.astype(w2_ref.dtype)

    # Layer 2: Linear + ReLU.
    h2 = jnp.dot(h1, w2_ref[...], preferred_element_type=jnp.float32)
    h2 = jnp.maximum(h2 + b2_ref[...], 0.0)
    # Dropout (eval mode) == identity.
    h2 = h2.astype(w3_ref.dtype)

    # Layer 3: output projection.
    out = jnp.dot(h2, w3_ref[...], preferred_element_type=jnp.float32)
    out_ref[...] = (out + b3_ref[...]).astype(out_ref.dtype)


def prepare_params(raw_params, *, compute_dtype=jnp.bfloat16):
    """Pad/cast weights ONCE, outside the hot path.

    raw_params: (w1, b1, w2, b2, w3, b3), w[i]: [in, out] f32, b[i]: [1, out] f32.
    Hidden/output dims zero-padded to multiples of 128 (exact: zero weights and
    ReLU(0)=0 contribute nothing); the latent (K) dim of w1 is left unpadded.
    """
    w1, b1, w2, b2, w3, b3 = raw_params
    L, H = w1.shape
    I = w3.shape[1]
    Hp = _round_up(H, 128)
    Ip = _round_up(I, 128)

    w1p = _pad2(w1, L, Hp, compute_dtype)
    w2p = _pad2(w2, Hp, Hp, compute_dtype)
    w3p = _pad2(w3, Hp, Ip, compute_dtype)
    b1p = _pad2(b1, 1, Hp, jnp.float32)
    b2p = _pad2(b2, 1, Hp, jnp.float32)
    b3p = _pad2(b3, 1, Ip, jnp.float32)
    return (w1p, b1p, w2p, b2p, w3p, b3p)


def _choose_batch_tile(B: int, block_b: int):
    """Batch tile: multiple of 16 (bf16 sublanes), bounded padding waste, and
    at least 2 grid steps when B > 16 so v7x megacore has work for both TCs."""
    min_tiles = 2 if B > 16 else 1
    n_tiles = max(min_tiles, pl.cdiv(B, block_b))
    TB = _round_up(pl.cdiv(B, n_tiles), 16)
    Bp = TB * pl.cdiv(B, TB)
    return TB, Bp


def generator_forward(z, prepared_params, img_size, *, block_b: int = 512,
                      compute_dtype=jnp.bfloat16, out_dtype=jnp.float32):
    """Pallas forward. z: [B, latent_size] f32. Returns [B, img_size] out_dtype."""
    w1p, b1p, w2p, b2p, w3p, b3p = prepared_params
    B, L = z.shape
    assert w1p.shape[0] == L, (w1p.shape, L)
    Hp = w1p.shape[1]
    Ip = w3p.shape[1]
    I = img_size

    TB, Bp = _choose_batch_tile(B, block_b)
    grid = (Bp // TB,)

    # Only the batch dim of z is padded; the latent dim uses a full-extent block.
    zp = _pad2(z, Bp, L, compute_dtype)

    # ---- VMEM budget (generation aware) ----
    act_it = jnp.dtype(compute_dtype).itemsize
    out_it = jnp.dtype(out_dtype).itemsize
    weight_bytes = (L * Hp + Hp * Hp + Hp * Ip) * act_it + (2 * Hp + Ip) * 4
    stream_bytes = 2 * TB * L * act_it + 2 * TB * Ip * out_it    # double-buffered z / out
    live_bytes = 2 * TB * Hp * 4 + TB * Ip * 4                   # f32 intermediates
    vmem_budget = int(1.25 * (weight_bytes + stream_bytes + live_bytes)) + (2 << 20)
    try:
        vmem_capacity = int(getattr(pltpu.get_tpu_info(), "vmem_capacity_bytes",
                                    64 * 1024 * 1024))
    except Exception:
        vmem_capacity = 64 * 1024 * 1024          # conservative (v7x per-TC)
    vmem_cap = vmem_capacity - max(16 * 1024 * 1024, vmem_capacity // 4)
    vmem_limit = max(min(vmem_budget, vmem_cap), 16 * 1024 * 1024)

    cost = pl.CostEstimate(
        flops=2 * Bp * (L * Hp + Hp * Hp + Hp * Ip),
        transcendentals=0,
        bytes_accessed=Bp * L * act_it + Bp * Ip * out_it + weight_bytes,
    )

    def build_and_call(weight_buffer_count):
        def resident(shape):
            # Weights/biases: full-array block, constant index map -> DMA'd once,
            # VMEM-resident across all batch-grid steps.
            if weight_buffer_count is None:
                return pl.BlockSpec(shape, lambda i: (0, 0))
            return pl.BlockSpec(shape, lambda i: (0, 0),
                                pipeline_mode=pl.Buffered(weight_buffer_count))

        return pl.pallas_call(
            _generator_kernel,
            out_shape=jax.ShapeDtypeStruct((Bp, Ip), out_dtype),
            grid=grid,
            in_specs=[
                pl.BlockSpec((TB, L), lambda i: (i, 0)),     # z: streamed per batch tile
                resident((L, Hp)), resident((1, Hp)),        # layer 1
                resident((Hp, Hp)), resident((1, Hp)),       # layer 2
                resident((Hp, Ip)), resident((1, Ip)),       # layer 3
            ],
            out_specs=pl.BlockSpec((TB, Ip), lambda i: (i, 0)),
            compiler_params=pltpu.CompilerParams(
                dimension_semantics=("parallel",),
                vmem_limit_bytes=vmem_limit,
            ),
            cost_estimate=cost,
        )(zp, w1p, b1p, w2p, b2p, w3p, b3p)

    try:
        # Resident operands never change block index -> single-buffer them.
        out = build_and_call(1)
    except Exception:
        # Fallback for jax versions that reject single-buffered pipeline_mode.
        out = build_and_call(None)

    # Drop padding only if any exists; view(-1, img_size) is an identity reshape.
    if Bp != B or Ip != I:
        out = out[:B, :I]
    return out.reshape(-1, I)


def init_params(key, latent_size, hidden_size, img_size):
    """Init mirroring nn.Linear default U(-1/sqrt(fan_in), +1/sqrt(fan_in)).

    Weights stored [in, out] (transposed vs PyTorch) in f32; biases [1, out] f32.
    """
    keys = jax.random.split(key, 6)

    def linear(kw, kb, fan_in, fan_out):
        bound = 1.0 / math.sqrt(fan_in)
        w = jax.random.uniform(kw, (fan_in, fan_out), jnp.float32, -bound, bound)
        b = jax.random.uniform(kb, (1, fan_out), jnp.float32, -bound, bound)
        return w, b

    w1, b1 = linear(keys[0], keys[1], latent_size, hidden_size)
    w2, b2 = linear(keys[2], keys[3], hidden_size, hidden_size)
    w3, b3 = linear(keys[4], keys[5], hidden_size, img_size)
    return (w1, b1, w2, b2, w3, b3)


if __name__ == "__main__":
    # Small shapes consistent with the module's forward: z is [batch, latent_size].
    batch = 8
    latent_size = 32
    hidden_size = 64
    img_size = 128

    key = jax.random.PRNGKey(0)
    k_z, k_p = jax.random.split(key)

    z = jax.random.normal(k_z, (batch, latent_size), dtype=jnp.float32)
    raw_params = init_params(k_p, latent_size, hidden_size, img_size)
    params = prepare_params(raw_params)            # pad/cast once, outside the hot path

    out = generator_forward(z, params, img_size)
    out = jax.block_until_ready(out)

    # Pure-JAX reference mirroring the kernel's bf16-compute / f32-accumulate path
    # (eval-mode dropout == identity).
    w1, b1, w2, b2, w3, b3 = raw_params
    cd = jnp.bfloat16
    h = jnp.dot(z.astype(cd), w1.astype(cd), preferred_element_type=jnp.float32)
    h = jnp.maximum(h + b1, 0.0).astype(cd)
    h = jnp.dot(h, w2.astype(cd), preferred_element_type=jnp.float32)
    h = jnp.maximum(h + b2, 0.0).astype(cd)
    ref = jnp.dot(h, w3.astype(cd), preferred_element_type=jnp.float32) + b3
    ref = ref.reshape(-1, img_size)

    assert out.shape == (batch, img_size), out.shape
    assert jnp.allclose(out, ref, atol=1e-2, rtol=1e-2), float(jnp.max(jnp.abs(out - ref)))

    print("KERNEL_OK")
</pallas_src>

<mosaic_0001>
module attributes {stable_mosaic.version = 11 : i64} {
  func.func @_generator_kernel(%arg0: i32, %arg1: memref<16x32xbf16, #tpu.memory_space<vmem>>, %arg2: memref<32x128xbf16, #tpu.memory_space<vmem>>, %arg3: memref<1x128xf32, #tpu.memory_space<vmem>>, %arg4: memref<128x128xbf16, #tpu.memory_space<vmem>>, %arg5: memref<1x128xf32, #tpu.memory_space<vmem>>, %arg6: memref<128x128xbf16, #tpu.memory_space<vmem>>, %arg7: memref<1x128xf32, #tpu.memory_space<vmem>>, %arg8: memref<16x128xf32, #tpu.memory_space<vmem>>) attributes {dimension_semantics = [#tpu.dimension_semantics<parallel>], iteration_bounds = array<i64: 1>, scalar_prefetch = 0 : i64, scratch_operands = 0 : i64, tpu.core_type = #tpu.core_type<tc>, window_params = [{transform_indices = @transform_0, window_bounds = array<i64: 16, 32>}, {pipeline_mode = #tpu.pipeline_mode<synchronous>, transform_indices = @transform_1, window_bounds = array<i64: 32, 128>}, {pipeline_mode = #tpu.pipeline_mode<synchronous>, transform_indices = @transform_2, window_bounds = array<i64: 1, 128>}, {pipeline_mode = #tpu.pipeline_mode<synchronous>, transform_indices = @transform_3, window_bounds = array<i64: 128, 128>}, {pipeline_mode = #tpu.pipeline_mode<synchronous>, transform_indices = @transform_4, window_bounds = array<i64: 1, 128>}, {pipeline_mode = #tpu.pipeline_mode<synchronous>, transform_indices = @transform_5, window_bounds = array<i64: 128, 128>}, {pipeline_mode = #tpu.pipeline_mode<synchronous>, transform_indices = @transform_6, window_bounds = array<i64: 1, 128>}, {transform_indices = @transform_7, window_bounds = array<i64: 16, 128>}]} {
    %c0 = arith.constant 0 : index
    %c0_0 = arith.constant 0 : index
    %0 = vector.load %arg1[%c0, %c0_0] : memref<16x32xbf16, #tpu.memory_space<vmem>>, vector<16x32xbf16>
    %c0_1 = arith.constant 0 : index
    %c0_2 = arith.constant 0 : index
    %1 = vector.load %arg2[%c0_1, %c0_2] : memref<32x128xbf16, #tpu.memory_space<vmem>>, vector<32x128xbf16>
    %cst = arith.constant dense<0.000000e+00> : vector<16x128xf32>
    %2 = tpu.matmul %0, %1, %cst {dimension_numbers = #tpu.dot_dimension_numbers<[1], [0], [0], [1], [0, 0, 1, 1], [], []>} : vector<16x32xbf16>, vector<32x128xbf16>, vector<16x128xf32> -> vector<16x128xf32>
    %c0_3 = arith.constant 0 : index
    %c0_4 = arith.constant 0 : index
    %3 = vector.load %arg3[%c0_3, %c0_4] : memref<1x128xf32, #tpu.memory_space<vmem>>, vector<1x128xf32>
    %4 = vector.broadcast %3 : vector<1x128xf32> to vector<16x128xf32>
    %5 = arith.addf %2, %4 : vector<16x128xf32>
    %cst_5 = arith.constant 0.000000e+00 : f32
    %6 = vector.broadcast %cst_5 : f32 to vector<16x128xf32>
    %7 = arith.maximumf %5, %6 : vector<16x128xf32>
    %8 = arith.truncf %7 : vector<16x128xf32> to vector<16x128xbf16>
    %c0_6 = arith.constant 0 : index
    %c0_7 = arith.constant 0 : index
    %9 = vector.load %arg4[%c0_6, %c0_7] : memref<128x128xbf16, #tpu.memory_space<vmem>>, vector<128x128xbf16>
    %cst_8 = arith.constant dense<0.000000e+00> : vector<16x128xf32>
    %10 = tpu.matmul %8, %9, %cst_8 {dimension_numbers = #tpu.dot_dimension_numbers<[1], [0], [0], [1], [0, 0, 1, 1], [], []>} : vector<16x128xbf16>, vector<128x128xbf16>, vector<16x128xf32> -> vector<16x128xf32>
    %c0_9 = arith.constant 0 : index
    %c0_10 = arith.constant 0 : index
    %11 = vector.load %arg5[%c0_9, %c0_10] : memref<1x128xf32, #tpu.memory_space<vmem>>, vector<1x128xf32>
    %12 = vector.broadcast %11 : vector<1x128xf32> to vector<16x128xf32>
    %13 = arith.addf %10, %12 : vector<16x128xf32>
    %cst_11 = arith.constant 0.000000e+00 : f32
    %14 = vector.broadcast %cst_11 : f32 to vector<16x128xf32>
    %15 = arith.maximumf %13, %14 : vector<16x128xf32>
    %16 = arith.truncf %15 : vector<16x128xf32> to vector<16x128xbf16>
    %c0_12 = arith.constant 0 : index
    %c0_13 = arith.constant 0 : index
    %17 = vector.load %arg6[%c0_12, %c0_13] : memref<128x128xbf16, #tpu.memory_space<vmem>>, vector<128x128xbf16>
    %cst_14 = arith.constant dense<0.000000e+00> : vector<16x128xf32>
    %18 = tpu.matmul %16, %17, %cst_14 {dimension_numbers = #tpu.dot_dimension_numbers<[1], [0], [0], [1], [0, 0, 1, 1], [], []>} : vector<16x128xbf16>, vector<128x128xbf16>, vector<16x128xf32> -> vector<16x128xf32>
    %c0_15 = arith.constant 0 : index
    %c0_16 = arith.constant 0 : index
    %19 = vector.load %arg7[%c0_15, %c0_16] : memref<1x128xf32, #tpu.memory_space<vmem>>, vector<1x128xf32>
    %20 = vector.broadcast %19 : vector<1x128xf32> to vector<16x128xf32>
    %21 = arith.addf %18, %20 : vector<16x128xf32>
    %c0_17 = arith.constant 0 : index
    %c0_18 = arith.constant 0 : index
    %22 = vector.load %arg8[%c0_17, %c0_18] : memref<16x128xf32, #tpu.memory_space<vmem>>, vector<16x128xf32>
    tpu.vector_store %arg8[%c0_17, %c0_18], %21 {strides = array<i32>} : memref<16x128xf32, #tpu.memory_space<vmem>>, vector<16x128xf32>,
    return
  }
  func.func @transform_0(%arg0: i32) -> (i32, i32) {
    %c0_i32 = arith.constant 0 : i32
    %c0_i32_0 = arith.constant 0 : i32
    return %arg0, %c0_i32 : i32, i32
  }
  func.func @transform_1(%arg0: i32) -> (i32, i32) {
    %c0_i32 = arith.constant 0 : i32
    %c0_i32_0 = arith.constant 0 : i32
    %c0_i32_1 = arith.constant 0 : i32
    return %c0_i32, %c0_i32_0 : i32, i32
  }
  func.func @transform_2(%arg0: i32) -> (i32, i32) {
    %c0_i32 = arith.constant 0 : i32
    %c0_i32_0 = arith.constant 0 : i32
    %c0_i32_1 = arith.constant 0 : i32
    return %c0_i32, %c0_i32_0 : i32, i32
  }
  func.func @transform_3(%arg0: i32) -> (i32, i32) {
    %c0_i32 = arith.constant 0 : i32
    %c0_i32_0 = arith.constant 0 : i32
    %c0_i32_1 = arith.constant 0 : i32
    return %c0_i32, %c0_i32_0 : i32, i32
  }
  func.func @transform_4(%arg0: i32) -> (i32, i32) {
    %c0_i32 = arith.constant 0 : i32
    %c0_i32_0 = arith.constant 0 : i32
    %c0_i32_1 = arith.constant 0 : i32
    return %c0_i32, %c0_i32_0 : i32, i32
  }
  func.func @transform_5(%arg0: i32) -> (i32, i32) {
    %c0_i32 = arith.constant 0 : i32
    %c0_i32_0 = arith.constant 0 : i32
    %c0_i32_1 = arith.constant 0 : i32
    return %c0_i32, %c0_i32_0 : i32, i32
  }
  func.func @transform_6(%arg0: i32) -> (i32, i32) {
    %c0_i32 = arith.constant 0 : i32
    %c0_i32_0 = arith.constant 0 : i32
    %c0_i32_1 = arith.constant 0 : i32
    return %c0_i32, %c0_i32_0 : i32, i32
  }
  func.func @transform_7(%arg0: i32) -> (i32, i32) {
    %c0_i32 = arith.constant 0 : i32
    %c0_i32_0 = arith.constant 0 : i32
    return %arg0, %c0_i32 : i32, i32
  }
}

module attributes {stable_mosaic.version = 11 : i64} {
  func.func @_generator_kernel(%arg0: i32, %arg1: memref<16x32xbf16, #tpu.memory_space<vmem>>, %arg2: memref<32x128xbf16, #tpu.memory_space<vmem>>, %arg3: memref<1x128xf32, #tpu.memory_space<vmem>>, %arg4: memref<128x128xbf16, #tpu.memory_space<vmem>>, %arg5: memref<1x128xf32, #tpu.memory_space<vmem>>, %arg6: memref<128x128xbf16, #tpu.memory_space<vmem>>, %arg7: memref<1x128xf32, #tpu.memory_space<vmem>>, %arg8: memref<16x128xf32, #tpu.memory_space<vmem>>) attributes {dimension_semantics = [#tpu.dimension_semantics<parallel>], iteration_bounds = array<i64: 1>, scalar_prefetch = 0 : i64, scratch_operands = 0 : i64, tpu.core_type = #tpu.core_type<tc>, window_params = [{transform_indices = @transform_0, window_bounds = array<i64: 16, 32>}, {pipeline_mode = #tpu.pipeline_mode<synchronous>, transform_indices = @transform_1, window_bounds = array<i64: 32, 128>}, {pipeline_mode = #tpu.pipeline_mode<synchronous>, transform_indices = @transform_2, window_bounds = array<i64: 1, 128>}, {pipeline_mode = #tpu.pipeline_mode<synchronous>, transform_indices = @transform_3, window_bounds = array<i64: 128, 128>}, {pipeline_mode = #tpu.pipeline_mode<synchronous>, transform_indices = @transform_4, window_bounds = array<i64: 1, 128>}, {pipeline_mode = #tpu.pipeline_mode<synchronous>, transform_indices = @transform_5, window_bounds = array<i64: 128, 128>}, {pipeline_mode = #tpu.pipeline_mode<synchronous>, transform_indices = @transform_6, window_bounds = array<i64: 1, 128>}, {transform_indices = @transform_7, window_bounds = array<i64: 16, 128>}]} {
    %c0 = arith.constant 0 : index
    %c0_0 = arith.constant 0 : index
    %0 = vector.load %arg1[%c0, %c0_0] : memref<16x32xbf16, #tpu.memory_space<vmem>>, vector<16x32xbf16>
    %c0_1 = arith.constant 0 : index
    %c0_2 = arith.constant 0 : index
    %1 = vector.load %arg2[%c0_1, %c0_2] : memref<32x128xbf16, #tpu.memory_space<vmem>>, vector<32x128xbf16>
    %cst = arith.constant dense<0.000000e+00> : vector<16x128xf32>
    %2 = tpu.matmul %0, %1, %cst {dimension_numbers = #tpu.dot_dimension_numbers<[1], [0], [0], [1], [0, 0, 1, 1], [], []>} : vector<16x32xbf16>, vector<32x128xbf16>, vector<16x128xf32> -> vector<16x128xf32>
    %c0_3 = arith.constant 0 : index
    %c0_4 = arith.constant 0 : index
    %3 = vector.load %arg3[%c0_3, %c0_4] : memref<1x128xf32, #tpu.memory_space<vmem>>, vector<1x128xf32>
    %4 = vector.broadcast %3 : vector<1x128xf32> to vector<16x128xf32>
    %5 = arith.addf %2, %4 : vector<16x128xf32>
    %cst_5 = arith.constant 0.000000e+00 : f32
    %6 = vector.broadcast %cst_5 : f32 to vector<16x128xf32>
    %7 = arith.maximumf %5, %6 : vector<16x128xf32>
    %8 = arith.truncf %7 : vector<16x128xf32> to vector<16x128xbf16>
    %c0_6 = arith.constant 0 : index
    %c0_7 = arith.constant 0 : index
    %9 = vector.load %arg4[%c0_6, %c0_7] : memref<128x128xbf16, #tpu.memory_space<vmem>>, vector<128x128xbf16>
    %cst_8 = arith.constant dense<0.000000e+00> : vector<16x128xf32>
    %10 = tpu.matmul %8, %9, %cst_8 {dimension_numbers = #tpu.dot_dimension_numbers<[1], [0], [0], [1], [0, 0, 1, 1], [], []>} : vector<16x128xbf16>, vector<128x128xbf16>, vector<16x128xf32> -> vector<16x128xf32>
    %c0_9 = arith.constant 0 : index
    %c0_10 = arith.constant 0 : index
    %11 = vector.load %arg5[%c0_9, %c0_10] : memref<1x128xf32, #tpu.memory_space<vmem>>, vector<1x128xf32>
    %12 = vector.broadcast %11 : vector<1x128xf32> to vector<16x128xf32>
    %13 = arith.addf %10, %12 : vector<16x128xf32>
    %cst_11 = arith.constant 0.000000e+00 : f32
    %14 = vector.broadcast %cst_11 : f32 to vector<16x128xf32>
    %15 = arith.maximumf %13, %14 : vector<16x128xf32>
    %16 = arith.truncf %15 : vector<16x128xf32> to vector<16x128xbf16>
    %c0_12 = arith.constant 0 : index
    %c0_13 = arith.constant 0 : index
    %17 = vector.load %arg6[%c0_12, %c0_13] : memref<128x128xbf16, #tpu.memory_space<vmem>>, vector<128x128xbf16>
    %cst_14 = arith.constant dense<0.000000e+00> : vector<16x128xf32>
    %18 = tpu.matmul %16, %17, %cst_14 {dimension_numbers = #tpu.dot_dimension_numbers<[1], [0], [0], [1], [0, 0, 1, 1], [], []>} : vector<16x128xbf16>, vector<128x128xbf16>, vector<16x128xf32> -> vector<16x128xf32>
    %c0_15 = arith.constant 0 : index
    %c0_16 = arith.constant 0 : index
    %19 = vector.load %arg7[%c0_15, %c0_16] : memref<1x128xf32, #tpu.memory_space<vmem>>, vector<1x128xf32>
    %20 = vector.broadcast %19 : vector<1x128xf32> to vector<16x128xf32>
    %21 = arith.addf %18, %20 : vector<16x128xf32>
    %c0_17 = arith.constant 0 : index
    %c0_18 = arith.constant 0 : index
    %22 = vector.load %arg8[%c0_17, %c0_18] : memref<16x128xf32, #tpu.memory_space<vmem>>, vector<16x128xf32>
    tpu.vector_store %arg8[%c0_17, %c0_18], %21 {strides = array<i32>} : memref<16x128xf32, #tpu.memory_space<vmem>>, vector<16x128xf32>,
    return
  }
  func.func @transform_0(%arg0: i32) -> (i32, i32) {
    %c0_i32 = arith.constant 0 : i32
    %c0_i32_0 = arith.constant 0 : i32
    return %arg0, %c0_i32 : i32, i32
  }
  func.func @transform_1(%arg0: i32) -> (i32, i32) {
    %c0_i32 = arith.constant 0 : i32
    %c0_i32_0 = arith.constant 0 : i32
    %c0_i32_1 = arith.constant 0 : i32
    return %c0_i32, %c0_i32_0 : i32, i32
  }
  func.func @transform_2(%arg0: i32) -> (i32, i32) {
    %c0_i32 = arith.constant 0 : i32
    %c0_i32_0 = arith.constant 0 : i32
    %c0_i32_1 = arith.constant 0 : i32
    return %c0_i32, %c0_i32_0 : i32, i32
  }
  func.func @transform_3(%arg0: i32) -> (i32, i32) {
    %c0_i32 = arith.constant 0 : i32
    %c0_i32_0 = arith.constant 0 : i32
    %c0_i32_1 = arith.constant 0 : i32
    return %c0_i32, %c0_i32_0 : i32, i32
  }
  func.func @transform_4(%arg0: i32) -> (i32, i32) {
    %c0_i32 = arith.constant 0 : i32
    %c0_i32_0 = arith.constant 0 : i32
    %c0_i32_1 = arith.constant 0 : i32
    return %c0_i32, %c0_i32_0 : i32, i32
  }
  func.func @transform_5(%arg0: i32) -> (i32, i32) {
    %c0_i32 = arith.constant 0 : i32
    %c0_i32_0 = arith.constant 0 : i32
    %c0_i32_1 = arith.constant 0 : i32
    return %c0_i32, %c0_i32_0 : i32, i32
  }
  func.func @transform_6(%arg0: i32) -> (i32, i32) {
    %c0_i32 = arith.constant 0 : i32
    %c0_i32_0 = arith.constant 0 : i32
    %c0_i32_1 = arith.constant 0 : i32
    return %c0_i32, %c0_i32_0 : i32, i32
  }
  func.func @transform_7(%arg0: i32) -> (i32, i32) {
    %c0_i32 = arith.constant 0 : i32
    %c0_i32_0 = arith.constant 0 : i32
    return %arg0, %c0_i32 : i32, i32
  }
}

</mosaic_0001>

<bundles_post_ra>
// kernel: tpu_custom_call.1
= control target key start
LH: loop header
LB: loop body
LE: loop exit
PB: predicated region body
PF: predicated region fallthrough
CT: control target
= control target key end

     0   :  { %12 = vsyncpa [#allocation3], 0  ;;  %s638_s0 = inlined_call_operand.hbm [shape: bf16[16,32], index: 0, kind: input, shape index: {}]   ;;  %s639_s1 = inlined_call_operand.hbm [shape: bf16[32,128], index: 1, kind: input, shape index: {}]   ;;  %s640_s2 = inlined_call_operand.vmem [shape: f32[1,128], index: 2, kind: input, shape index: {}]   ;;  %s641_s3 = inlined_call_operand.hbm [shape: bf16[128,128], index: 3, kind: input, shape index: {}]   ;;  %s642_s4 = inlined_call_operand.vmem [shape: f32[1,128], index: 4, kind: input, shape index: {}]   ;;  %s643_s5 = inlined_call_operand.hbm [shape: bf16[128,128], index: 5, kind: input, shape index: {}]   ;;  %s644_s6 = inlined_call_operand.vmem [shape: f32[1,128], index: 6, kind: input, shape index: {}]   ;;  %s645_s7 = inlined_call_operand.hbm [shape: f32[16,128], index: 7, kind: output, shape index: {}]  }
   0x1   :  { %13 = vsyncpa [#allocation6], 0 }
   0x2   :  { %14 = vsyncpa [#allocation9], 0 }
   0x3   :  { %15 = vsyncpa [#allocation4], 0  ;;  %s33_s26 = sshll.u32 %s639_s1, 4  ;;  %s565_s27 = smov [#allocation5]   ;;  %s34_s26 = int_to_ptr.hbm [resolvable:$true] %s33_s26 }
   0x4   :  { %s35_s28 = sshll.u32 %s565_s27, 4  ;;  %s20_s8 = sshll.u32 %s638_s0, 4  ;;  %s36_s28 = int_to_ptr.vmem [resolvable:$true] %s35_s28  ;;  %s21_s8 = int_to_ptr.hbm [resolvable:$true] %s20_s8 }
   0x5   :  { %s566_s9 = smov 64   ;;  %s567_s10 = smov 4  }
   0x6   :  { %41 = dma.hbm_to_vmem [thread:$0]  %s34_s26, 256, %s36_s28, [#allocation6], %s566_s9, %s566_s9, %s567_s10  }
   0x7   :  { %s568_s11 = smov [#allocation2]   ;;  %s48_s15 = sshll.u32 %s641_s3, 4  ;;  %s49_s15 = int_to_ptr.hbm [resolvable:$true] %s48_s15 }
   0x8   :  { %s22_s12 = sshll.u32 %s568_s11, 4  ;;  %s63_s17 = sshll.u32 %s643_s5, 4  ;;  %s23_s12 = int_to_ptr.vmem [resolvable:$true] %s22_s12  ;;  %s64_s17 = int_to_ptr.hbm [resolvable:$true] %s63_s17 }
   0x9   :  { %28 = dma.hbm_to_vmem [thread:$0]  %s21_s8, 128, %s23_s12, [#allocation3], %s566_s9, %s566_s9, %s567_s10  }
   0xa   :  { %s569_s18 = smov [#allocation7]   ;;  %s570_s0 = smov [#allocation8]  }
   0xb   :  { %s50_s19 = sshll.u32 %s569_s18, 4  ;;  %s65_s20 = sshll.u32 %s570_s0, 4  ;;  %s51_s19 = int_to_ptr.vmem [resolvable:$true] %s50_s19  ;;  %s66_s20 = int_to_ptr.vmem [resolvable:$true] %s65_s20 }
   0xc   :  { %56 = dma.hbm_to_vmem [thread:$0]  %s49_s15, 1024, %s51_s19, [#allocation6], %s566_s9, %s566_s9, %s567_s10  }
   0xd   :  { %71 = dma.hbm_to_vmem [thread:$0]  %s64_s17, 1024, %s66_s20, [#allocation9], %s566_s9, %s566_s9, %s567_s10  }
   0xe   :  { %557 = dma.done.wait [#allocation3], 128  }
   0xf   :  { %558 = vsyncadd [#allocation3], 4294967168 }
  0x10   :  { %559 = dma.done.wait [#allocation6], 1280  }
  0x11   :  { %560 = vsyncadd [#allocation6], 4294966016 }
  0x12   :  { %561 = dma.done.wait [#allocation9], 1024  }
  0x13   :  { %562 = vsyncadd [#allocation9], 4294966272  ;;  %v408_v0 = vld [vmem:[#allocation5 + $0x8] sm:$0xff]  ;;  %v407_v2 = vld [vmem:[#allocation5] sm:$0xff]  ;;  %vm118_vm0 = vcmask 261120   ;;  %s571_s24 = smov [#allocation10]  }
  0x14   :  { %v416_v1 = vld [vmem:[#allocation7 + $0x38] sm:$0xff]  ;;  %128 = vmatpush.bf16.msra.mxu0 %v408_v0  ;;  %v415_v3 = vld [vmem:[#allocation7 + $0x30] sm:$0xff]  ;;  %v406_v4 = vld [vmem:[#allocation2] sm:$0xff]  ;;  %s312_s25 = sshll.u32 %s571_s24, 4  ;;  %s572_s28 = smov 128   ;;  %s313_s25 = int_to_ptr.vmem [resolvable:$true] %s312_s25 }
  0x15   :  { %207 = vmatpush.bf16.msra.mxu1 %v416_v1  ;;  %v414_v5 = vld [vmem:[#allocation7 + $0x28] sm:$0xff]  ;;  %v413_v6 = vld [vmem:[#allocation7 + $0x20] sm:$0xff]  ;;  %v412_v7 = vld [vmem:[#allocation7 + $0x18] sm:$0xff]  ;;  %s573_s29 = smov 8  }
  0x16   :  { %v411_v8 = vld [vmem:[#allocation7 + $0x10] sm:$0xff]  ;;  %v410_v9 = vld [vmem:[#allocation7 + $0x8] sm:$0xff]  ;;  %v409_v10 = vld [vmem:[#allocation7] sm:$0xff] }
  0x17   :  { %v424_v11 = vld [vmem:[#allocation8 + $0x38] sm:$0xff]  ;;  %v423_v12 = vld [vmem:[#allocation8 + $0x30] sm:$0xff]  ;;  %v422_v13 = vld [vmem:[#allocation8 + $0x28] sm:$0xff] }
  0x18   :  { %129 = vmatpush.bf16.msra.mxu0 %v407_v2  ;;  %292 = vmatpush.bf16.msra.mxu2 %v424_v11  ;;  %v421_v14 = vld [vmem:[#allocation8 + $0x20] sm:$0xff]  ;;  %v434_v16 = vld [vmem:[%s640_s2] ss:$0 sm:$0xff]  ;;  %v420_v23 = vld [vmem:[#allocation8 + $0x18] sm:$0xff] }
  0x19   :  { %208 = vmatpush.bf16.msra.mxu1 %v415_v3  ;;  %v419_v24 = vld [vmem:[#allocation8 + $0x10] sm:$0xff]  ;;  %v418_v25 = vld [vmem:[#allocation8 + $0x8] sm:$0xff]  ;;  %v417_v26 = vld [vmem:[#allocation8] sm:$0xff] }
  0x1a   :  { %v435_v28 = vld [vmem:[%s642_s4] ss:$0 sm:$0xff]  ;;  %s314_s4 = sshll.u32 %s645_s7, 4  ;;  %s315_s4 = int_to_ptr.hbm [resolvable:$true] %s314_s4 }
  0x1b   :  { %341 = vmatmul.msk.bf16.vlgmr.msra.gmra.mxu0 %vm118_vm0, %v406_v4  ;;  %v436_v35 = vld [vmem:[%s644_s6] ss:$0 sm:$0xff] }
  0x1c   :  { %293 = vmatpush.bf16.msra.mxu2 %v423_v12 }
  0x1d   :  { %209 = vmatpush.bf16.msra.mxu1 %v414_v5 }
  0x20   :  { %294 = vmatpush.bf16.msra.mxu2 %v422_v13 }
  0x21   :  { %210 = vmatpush.bf16.msra.mxu1 %v413_v6 }
  0x24   :  { %295 = vmatpush.bf16.msra.mxu2 %v421_v14 }
  0x25   :  { %211 = vmatpush.bf16.msra.mxu1 %v412_v7 }
  0x28   :  { %296 = vmatpush.bf16.msra.mxu2 %v420_v23 }
  0x29   :  { %212 = vmatpush.bf16.msra.mxu1 %v411_v8 }
  0x2c   :  { %297 = vmatpush.bf16.msra.mxu2 %v419_v24 }
  0x2d   :  { %213 = vmatpush.bf16.msra.mxu1 %v410_v9 }
  0x30   :  { %298 = vmatpush.bf16.msra.mxu2 %v418_v25 }
  0x31   :  { %214 = vmatpush.bf16.msra.mxu1 %v409_v10 }
  0x34   :  { %299 = vmatpush.bf16.msra.mxu2 %v417_v26 }
  0x98   :  { %v131_v15 = vpop.f32.mrf.mxu0 }
  0x99   :  { %v132_v17 = vadd.f32 %v434_v16, %v131_v15 }
  0x9b   :  { %v136_v20 = vmax.f32 %v132_v17, 0.0 }
  0xa0   :  { %v133_v18 = vpop.f32.mrf.mxu0 }
  0xa1   :  { %v134_v19 = vadd.f32 %v434_v16, %v133_v18 }
  0xa3   :  { %v137_v21 = vmax.f32 %v134_v19, 0.0 }
  0xa5   :  { %v138_v22 = vpack.c.bf16 %v137_v21, %v136_v20 }
  0xa7   :  { %215 = vmatmul.bf16.vlgmr.msra.gmra.mxu1 %v138_v22 }
 0x124   :  { %v216_v27 = vpop.f32.mrf.mxu1 }
 0x125   :  { %v217_v29 = vadd.f32 %v435_v28, %v216_v27 }
 0x127   :  { %v221_v32 = vmax.f32 %v217_v29, 0.0 }
 0x12c   :  { %v218_v30 = vpop.f32.mrf.mxu1 }
 0x12d   :  { %v219_v31 = vadd.f32 %v435_v28, %v218_v30 }
 0x12f   :  { %v222_v33 = vmax.f32 %v219_v31, 0.0 }
 0x131   :  { %v223_v34 = vpack.c.bf16 %v222_v33, %v221_v32 }
 0x133   :  { %300 = vmatmul.bf16.vlgmr.msra.gmra.mxu2 %v223_v34 }
 0x1b6   :  { %v301_v36 = vpop.f32.mrf.mxu2 }
 0x1b7   :  { %v302_v37 = vadd.f32 %v436_v35, %v301_v36 }
 0x1b9   :  { %306 = vst [vmem:[#allocation10] sm:$0xff] %v302_v37 }
 0x1be   :  { %v303_v38 = vpop.f32.mrf.mxu2 }
 0x1bf   :  { %v304_v39 = vadd.f32 %v436_v35, %v303_v38 }
 0x1c1   :  { %307 = vst [vmem:[#allocation10 + $0x8] sm:$0xff] %v304_v39 }
 0x1c2   :  { %320 = dma.vmem_to_hbm [thread:$0]  %s313_s25, 256, %s315_s4, [#allocation4], %s572_s28, %s572_s28, %s573_s29  }
 0x1c3   :  { %563 = dma.done.wait [#allocation4], 256  }
 0x1c4   :  { %564 = vsyncadd [#allocation4], 4294967040 }
 0x1c5   :  { %325 = vsyncpa [#allocation3], 1 }
 0x1c6   :  { %326 = vsyncpa [#allocation6], 1 }
 0x1c7   :  { %327 = vsyncpa [#allocation9], 1 }
 0x1c8   :  { %328 = vsyncpa [#allocation4], 1 }

// kernel: tpu_custom_call.1
= control target key start
LH: loop header
LB: loop body
LE: loop exit
PB: predicated region body
PF: predicated region fallthrough
CT: control target
= control target key end

     0   :  { %12 = vsyncpa [#allocation3], 0  ;;  %s638_s0 = inlined_call_operand.hbm [shape: bf16[16,32], index: 0, kind: input, shape index: {}]   ;;  %s639_s1 = inlined_call_operand.hbm [shape: bf16[32,128], index: 1, kind: input, shape index: {}]   ;;  %s640_s2 = inlined_call_operand.vmem [shape: f32[1,128], index: 2, kind: input, shape index: {}]   ;;  %s641_s3 = inlined_call_operand.hbm [shape: bf16[128,128], index: 3, kind: input, shape index: {}]   ;;  %s642_s4 = inlined_call_operand.vmem [shape: f32[1,128], index: 4, kind: input, shape index: {}]   ;;  %s643_s5 = inlined_call_operand.hbm [shape: bf16[128,128], index: 5, kind: input, shape index: {}]   ;;  %s644_s6 = inlined_call_operand.vmem [shape: f32[1,128], index: 6, kind: input, shape index: {}]   ;;  %s645_s7 = inlined_call_operand.hbm [shape: f32[16,128], index: 7, kind: output, shape index: {}]  }
   0x1   :  { %13 = vsyncpa [#allocation6], 0 }
   0x2   :  { %14 = vsyncpa [#allocation9], 0 }
   0x3   :  { %15 = vsyncpa [#allocation4], 0  ;;  %s33_s26 = sshll.u32 %s639_s1, 4  ;;  %s565_s27 = smov [#allocation5]   ;;  %s34_s26 = int_to_ptr.hbm [resolvable:$true] %s33_s26 }
   0x4   :  { %s35_s28 = sshll.u32 %s565_s27, 4  ;;  %s20_s8 = sshll.u32 %s638_s0, 4  ;;  %s36_s28 = int_to_ptr.vmem [resolvable:$true] %s35_s28  ;;  %s21_s8 = int_to_ptr.hbm [resolvable:$true] %s20_s8 }
   0x5   :  { %s566_s9 = smov 64   ;;  %s567_s10 = smov 4  }
   0x6   :  { %41 = dma.hbm_to_vmem [thread:$0]  %s34_s26, 256, %s36_s28, [#allocation6], %s566_s9, %s566_s9, %s567_s10  }
   0x7   :  { %s568_s11 = smov [#allocation2]   ;;  %s48_s15 = sshll.u32 %s641_s3, 4  ;;  %s49_s15 = int_to_ptr.hbm [resolvable:$true] %s48_s15 }
   0x8   :  { %s22_s12 = sshll.u32 %s568_s11, 4  ;;  %s63_s17 = sshll.u32 %s643_s5, 4  ;;  %s23_s12 = int_to_ptr.vmem [resolvable:$true] %s22_s12  ;;  %s64_s17 = int_to_ptr.hbm [resolvable:$true] %s63_s17 }
   0x9   :  { %28 = dma.hbm_to_vmem [thread:$0]  %s21_s8, 128, %s23_s12, [#allocation3], %s566_s9, %s566_s9, %s567_s10  }
   0xa   :  { %s569_s18 = smov [#allocation7]   ;;  %s570_s0 = smov [#allocation8]  }
   0xb   :  { %s50_s19 = sshll.u32 %s569_s18, 4  ;;  %s65_s20 = sshll.u32 %s570_s0, 4  ;;  %s51_s19 = int_to_ptr.vmem [resolvable:$true] %s50_s19  ;;  %s66_s20 = int_to_ptr.vmem [resolvable:$true] %s65_s20 }
   0xc   :  { %56 = dma.hbm_to_vmem [thread:$0]  %s49_s15, 1024, %s51_s19, [#allocation6], %s566_s9, %s566_s9, %s567_s10  }
   0xd   :  { %71 = dma.hbm_to_vmem [thread:$0]  %s64_s17, 1024, %s66_s20, [#allocation9], %s566_s9, %s566_s9, %s567_s10  }
   0xe   :  { %557 = dma.done.wait [#allocation3], 128  }
   0xf   :  { %558 = vsyncadd [#allocation3], 4294967168 }
  0x10   :  { %559 = dma.done.wait [#allocation6], 1280  }
  0x11   :  { %560 = vsyncadd [#allocation6], 4294966016 }
  0x12   :  { %561 = dma.done.wait [#allocation9], 1024  }
  0x13   :  { %562 = vsyncadd [#allocation9], 4294966272  ;;  %v408_v0 = vld [vmem:[#allocation5 + $0x8] sm:$0xff]  ;;  %v407_v2 = vld [vmem:[#allocation5] sm:$0xff]  ;;  %vm118_vm0 = vcmask 261120   ;;  %s571_s24 = smov [#allocation10]  }
  0x14   :  { %v416_v1 = vld [vmem:[#allocation7 + $0x38] sm:$0xff]  ;;  %128 = vmatpush.bf16.msra.mxu0 %v408_v0  ;;  %v415_v3 = vld [vmem:[#allocation7 + $0x30] sm:$0xff]  ;;  %v406_v4 = vld [vmem:[#allocation2] sm:$0xff]  ;;  %s312_s25 = sshll.u32 %s571_s24, 4  ;;  %s572_s28 = smov 128   ;;  %s313_s25 = int_to_ptr.vmem [resolvable:$true] %s312_s25 }
  0x15   :  { %207 = vmatpush.bf16.msra.mxu1 %v416_v1  ;;  %v414_v5 = vld [vmem:[#allocation7 + $0x28] sm:$0xff]  ;;  %v413_v6 = vld [vmem:[#allocation7 + $0x20] sm:$0xff]  ;;  %v412_v7 = vld [vmem:[#allocation7 + $0x18] sm:$0xff]  ;;  %s573_s29 = smov 8  }
  0x16   :  { %v411_v8 = vld [vmem:[#allocation7 + $0x10] sm:$0xff]  ;;  %v410_v9 = vld [vmem:[#allocation7 + $0x8] sm:$0xff]  ;;  %v409_v10 = vld [vmem:[#allocation7] sm:$0xff] }
  0x17   :  { %v424_v11 = vld [vmem:[#allocation8 + $0x38] sm:$0xff]  ;;  %v423_v12 = vld [vmem:[#allocation8 + $0x30] sm:$0xff]  ;;  %v422_v13 = vld [vmem:[#allocation8 + $0x28] sm:$0xff] }
  0x18   :  { %129 = vmatpush.bf16.msra.mxu0 %v407_v2  ;;  %292 = vmatpush.bf16.msra.mxu2 %v424_v11  ;;  %v421_v14 = vld [vmem:[#allocation8 + $0x20] sm:$0xff]  ;;  %v434_v16 = vld [vmem:[%s640_s2] ss:$0 sm:$0xff]  ;;  %v420_v23 = vld [vmem:[#allocation8 + $0x18] sm:$0xff] }
  0x19   :  { %208 = vmatpush.bf16.msra.mxu1 %v415_v3  ;;  %v419_v24 = vld [vmem:[#allocation8 + $0x10] sm:$0xff]  ;;  %v418_v25 = vld [vmem:[#allocation8 + $0x8] sm:$0xff]  ;;  %v417_v26 = vld [vmem:[#allocation8] sm:$0xff] }
  0x1a   :  { %v435_v28 = vld [vmem:[%s642_s4] ss:$0 sm:$0xff]  ;;  %s314_s4 = sshll.u32 %s645_s7, 4  ;;  %s315_s4 = int_to_ptr.hbm [resolvable:$true] %s314_s4 }
  0x1b   :  { %341 = vmatmul.msk.bf16.vlgmr.msra.gmra.mxu0 %vm118_vm0, %v406_v4  ;;  %v436_v35 = vld [vmem:[%s644_s6] ss:$0 sm:$0xff] }
  0x1c   :  { %293 = vmatpush.bf16.msra.mxu2 %v423_v12 }
  0x1d   :  { %209 = vmatpush.bf16.msra.mxu1 %v414_v5 }
  0x20   :  { %294 = vmatpush.bf16.msra.mxu2 %v422_v13 }
  0x21   :  { %210 = vmatpush.bf16.msra.mxu1 %v413_v6 }
  0x24   :  { %295 = vmatpush.bf16.msra.mxu2 %v421_v14 }
  0x25   :  { %211 = vmatpush.bf16.msra.mxu1 %v412_v7 }
  0x28   :  { %296 = vmatpush.bf16.msra.mxu2 %v420_v23 }
  0x29   :  { %212 = vmatpush.bf16.msra.mxu1 %v411_v8 }
  0x2c   :  { %297 = vmatpush.bf16.msra.mxu2 %v419_v24 }
  0x2d   :  { %213 = vmatpush.bf16.msra.mxu1 %v410_v9 }
  0x30   :  { %298 = vmatpush.bf16.msra.mxu2 %v418_v25 }
  0x31   :  { %214 = vmatpush.bf16.msra.mxu1 %v409_v10 }
  0x34   :  { %299 = vmatpush.bf16.msra.mxu2 %v417_v26 }
  0x98   :  { %v131_v15 = vpop.f32.mrf.mxu0 }
  0x99   :  { %v132_v17 = vadd.f32 %v434_v16, %v131_v15 }
  0x9b   :  { %v136_v20 = vmax.f32 %v132_v17, 0.0 }
  0xa0   :  { %v133_v18 = vpop.f32.mrf.mxu0 }
  0xa1   :  { %v134_v19 = vadd.f32 %v434_v16, %v133_v18 }
  0xa3   :  { %v137_v21 = vmax.f32 %v134_v19, 0.0 }
  0xa5   :  { %v138_v22 = vpack.c.bf16 %v137_v21, %v136_v20 }
  0xa7   :  { %215 = vmatmul.bf16.vlgmr.msra.gmra.mxu1 %v138_v22 }
 0x124   :  { %v216_v27 = vpop.f32.mrf.mxu1 }
 0x125   :  { %v217_v29 = vadd.f32 %v435_v28, %v216_v27 }
 0x127   :  { %v221_v32 = vmax.f32 %v217_v29, 0.0 }
 0x12c   :  { %v218_v30 = vpop.f32.mrf.mxu1 }
 0x12d   :  { %v219_v31 = vadd.f32 %v435_v28, %v218_v30 }
 0x12f   :  { %v222_v33 = vmax.f32 %v219_v31, 0.0 }
 0x131   :  { %v223_v34 = vpack.c.bf16 %v222_v33, %v221_v32 }
 0x133   :  { %300 = vmatmul.bf16.vlgmr.msra.gmra.mxu2 %v223_v34 }
 0x1b6   :  { %v301_v36 = vpop.f32.mrf.mxu2 }
 0x1b7   :  { %v302_v37 = vadd.f32 %v436_v35, %v301_v36 }
 0x1b9   :  { %306 = vst [vmem:[#allocation10] sm:$0xff] %v302_v37 }
 0x1be   :  { %v303_v38 = vpop.f32.mrf.mxu2 }
 0x1bf   :  { %v304_v39 = vadd.f32 %v436_v35, %v303_v38 }
 0x1c1   :  { %307 = vst [vmem:[#allocation10 + $0x8] sm:$0xff] %v304_v39 }
 0x1c2   :  { %320 = dma.vmem_to_hbm [thread:$0]  %s313_s25, 256, %s315_s4, [#allocation4], %s572_s28, %s572_s28, %s573_s29  }
 0x1c3   :  { %563 = dma.done.wait [#allocation4], 256  }
 0x1c4   :  { %564 = vsyncadd [#allocation4], 4294967040 }
 0x1c5   :  { %325 = vsyncpa [#allocation3], 1 }
 0x1c6   :  { %326 = vsyncpa [#allocation6], 1 }
 0x1c7   :  { %327 = vsyncpa [#allocation9], 1 }
 0x1c8   :  { %328 = vsyncpa [#allocation4], 1 }

</bundles_post_ra>
